<compile_context>
chip_gen: v5e
topology: v5e:2x2
jax: 0.10.0
libtpu: 0.0.40
codegen_flags: <defaults>
</compile_context>

<pallas_src>
import jax
import jax.numpy as jnp
from jax.experimental import pallas as pl
from jax.experimental.pallas import tpu as pltpu

VMEM = pltpu.MemorySpace.VMEM


# ----------------------------- fused kernel ----------------------------------

def _fused_kernel(a_ref, x_ref, s1w_ref, s2w_ref, blk_w_ref, blk_b_ref,
                  fc_w_ref, bias_ref, o_ref):
    """Whole model on an (N, *) node tile; intermediates never leave vregs."""
    hidden1 = s1w_ref.shape[2]            # 16
    filters = s2w_ref.shape[2]            # 64
    out_dim = o_ref.shape[1]

    a = a_ref[...]                        # (N, N) bf16 mean-aggregation op
    xb = x_ref[...].astype(jnp.bfloat16)  # (N, Fin)

    bias = bias_ref[...]                  # (3, pack_w) f32, sliced below
    s1b = bias[0:1, 0:hidden1]
    s2b = bias[1:2, 0:filters]
    fcb = bias[2:3, 0:out_dim]

    # ---- SAGE1 + ReLU: lin_l(A @ x) + lin_r(x) + b, split into two dots ----
    # (self-path dot has no dependency on the aggregation dot -> overlaps it)
    self1 = jnp.dot(xb, s1w_ref[1], preferred_element_type=jnp.float32)
    aggr1 = jnp.dot(a, xb, preferred_element_type=jnp.float32)
    h = (jnp.dot(aggr1.astype(jnp.bfloat16), s1w_ref[0],
                 preferred_element_type=jnp.float32) + self1 + s1b)
    h = jnp.maximum(h, 0.0)               # (N, 16) f32
    hb = h.astype(jnp.bfloat16)

    # ---- SAGE2 with the ResNet stem conv folded in, then stem ReLU ----------
    self2 = jnp.dot(hb, s2w_ref[1], preferred_element_type=jnp.float32)
    aggr2 = jnp.dot(a, hb, preferred_element_type=jnp.float32)
    out = (jnp.dot(aggr2.astype(jnp.bfloat16), s2w_ref[0],
                   preferred_element_type=jnp.float32) + self2 + s2b)
    out = jnp.maximum(out, 0.0)           # (N, 64) f32

    # ---- 8 residual basic blocks, fully unrolled, weights VMEM-resident -----
    n_block = blk_w_ref.shape[0] // 2     # w1 in [0:8], w2 in [8:16]
    for i in range(n_block):              # static unroll
        hblk = jnp.maximum(
            jnp.dot(out.astype(jnp.bfloat16), blk_w_ref[i],
                    preferred_element_type=jnp.float32) + blk_b_ref[i], 0.0)
        out = jnp.maximum(
            out + jnp.dot(hblk.astype(jnp.bfloat16), blk_w_ref[n_block + i],
                          preferred_element_type=jnp.float32)
            + blk_b_ref[n_block + i], 0.0)

    # ---- final fc (64 -> input_dim); global avg pool over L=1 is identity ---
    o_ref[...] = (jnp.dot(out.astype(jnp.bfloat16), fc_w_ref[...],
                          preferred_element_type=jnp.float32) + fcb)


# ------------------------------- wrappers -------------------------------------

def build_mean_adjacency(edge_index, n):
    """Dense mean-aggregation operator: A[i, j] = 1/deg(i) for edge j -> i.

    Precomputed once per graph (outside the per-call hot path). Stored bf16 so
    the aggregation matmuls are single-pass bf16 x bf16 on the MXU."""
    src, tgt = edge_index[0], edge_index[1]
    adj = jnp.zeros((n, n), jnp.float32).at[tgt, src].add(1.0)
    deg = jnp.maximum(adj.sum(axis=1, keepdims=True), 1.0)
    return (adj / deg).astype(jnp.bfloat16)


@jax.jit
def forward(params, x, a_norm):
    n = x.shape[0]
    out_dim = params["fc_w"].shape[1]
    return pl.pallas_call(
        _fused_kernel,
        out_shape=jax.ShapeDtypeStruct((n, out_dim), jnp.float32),
        in_specs=[pl.BlockSpec(memory_space=VMEM)] * 8,
        out_specs=pl.BlockSpec(memory_space=VMEM),
    )(a_norm, x,
      params["sage1_w"], params["sage2s_w"],
      params["blk_w"], params["blk_b"],
      params["fc_w"], params["bias_pack"])


# ----------------------------- params -----------------------------------------

def init_params(key, input_dim, hidden1=16, hidden2=32, filters=64, n_block=8):
    def glorot(k, shape):
        fan_in, fan_out = shape[-2], shape[-1]
        lim = (6.0 / (fan_in + fan_out)) ** 0.5
        return jax.random.uniform(k, shape, jnp.float32, -lim, lim)

    keys = iter(jax.random.split(key, 20))

    # ----- raw (unfused) f32 parameters mirroring the PyTorch module ---------
    s1_wl = glorot(next(keys), (input_dim, hidden1))     # lin_l (aggr, biased)
    s1_wr = glorot(next(keys), (input_dim, hidden1))     # lin_r (self, no bias)
    s1_b = 0.01 * glorot(next(keys), (1, hidden1))
    s2_wl = glorot(next(keys), (hidden1, hidden2))
    s2_wr = glorot(next(keys), (hidden1, hidden2))
    s2_b = 0.01 * glorot(next(keys), (1, hidden2))
    stem_w = glorot(next(keys), (hidden2, filters))      # stem conv, BN folded
    stem_b = 0.01 * glorot(next(keys), (1, filters))
    blk_w1 = glorot(next(keys), (n_block, filters, filters))
    blk_b1 = 0.01 * glorot(next(keys), (n_block, 1, filters))
    blk_w2 = glorot(next(keys), (n_block, filters, filters))
    blk_b2 = 0.01 * glorot(next(keys), (n_block, 1, filters))
    fc_w = glorot(next(keys), (filters, input_dim))
    fc_b = 0.01 * glorot(next(keys), (1, input_dim))

    # ----- host-side fusion / packing for the kernel -------------------------
    # Fold the ResNet stem conv into SAGE2 (no nonlinearity between them).
    s2f_wl = s2_wl @ stem_w                              # (16, 64)
    s2f_wr = s2_wr @ stem_w                              # (16, 64)
    s2f_b = s2_b @ stem_w + stem_b                       # (1, 64)

    # Pack the three remaining (1, F) bias rows into a single buffer.
    pack_w = max(filters, hidden1, input_dim)
    bias_pack = jnp.zeros((3, pack_w), jnp.float32)
    bias_pack = bias_pack.at[0, :hidden1].set(s1_b[0])
    bias_pack = bias_pack.at[1, :filters].set(s2f_b[0])
    bias_pack = bias_pack.at[2, :input_dim].set(fc_b[0])

    return {
        # (2, Fin, 16): [0] = Wl (aggregation path), [1] = Wr (self path)
        "sage1_w": jnp.stack([s1_wl, s1_wr]).astype(jnp.bfloat16),
        # (2, 16, 64): SAGE2 weights with the stem conv folded in
        "sage2s_w": jnp.stack([s2f_wl, s2f_wr]).astype(jnp.bfloat16),
        # (2*n_block, 64, 64): conv1 weights at [0:8], conv2 weights at [8:16]
        "blk_w": jnp.concatenate([blk_w1, blk_w2], axis=0).astype(jnp.bfloat16),
        # (2*n_block, 1, 64) f32 biases, same layout
        "blk_b": jnp.concatenate([blk_b1, blk_b2], axis=0),
        # final fc (64 -> input_dim)
        "fc_w": fc_w.astype(jnp.bfloat16),
        # (3, max(64, input_dim)) f32: [sage1_b ; sage2'+stem b ; fc_b]
        "bias_pack": bias_pack,
    }


# ------------------------------- main ------------------------------------------

if __name__ == "__main__":
    INPUT_DIM = 8
    N_NODES = 16

    key = jax.random.PRNGKey(0)
    k_x, k_p = jax.random.split(key)

    x = jax.random.normal(k_x, (N_NODES, INPUT_DIM), jnp.float32)

    # deterministic graph: bidirectional ring
    idx = jnp.arange(N_NODES, dtype=jnp.int32)
    src = jnp.concatenate([idx, (idx + 1) % N_NODES])
    tgt = jnp.concatenate([(idx + 1) % N_NODES, idx])
    edge_index = jnp.stack([src, tgt], axis=0)           # (2, E)

    params = init_params(k_p, INPUT_DIM)

    # adjacency precomputed once per graph, not on the per-call hot path
    a_norm = jax.block_until_ready(build_mean_adjacency(edge_index, N_NODES))

    out = forward(params, x, a_norm)
    out = jax.block_until_ready(out)
    assert out.shape == (N_NODES, INPUT_DIM), out.shape
    assert bool(jnp.all(jnp.isfinite(out)))
    print("KERNEL_OK")
</pallas_src>

<mosaic_0001>
module attributes {stable_mosaic.version = 11 : i64} {
  func.func @_fused_kernel(%arg0: memref<16x16xbf16, #tpu.memory_space<vmem>>, %arg1: memref<16x8xf32, #tpu.memory_space<vmem>>, %arg2: memref<2x8x16xbf16, #tpu.memory_space<vmem>>, %arg3: memref<2x16x64xbf16, #tpu.memory_space<vmem>>, %arg4: memref<16x64x64xbf16, #tpu.memory_space<vmem>>, %arg5: memref<16x1x64xf32, #tpu.memory_space<vmem>>, %arg6: memref<64x8xbf16, #tpu.memory_space<vmem>>, %arg7: memref<3x64xf32, #tpu.memory_space<vmem>>, %arg8: memref<16x8xf32, #tpu.memory_space<vmem>>) attributes {dimension_semantics = [], scalar_prefetch = 0 : i64, scratch_operands = 0 : i64, tpu.core_type = #tpu.core_type<tc>} {
    %c0 = arith.constant 0 : index
    %c0_0 = arith.constant 0 : index
    %0 = vector.load %arg0[%c0, %c0_0] : memref<16x16xbf16, #tpu.memory_space<vmem>>, vector<16x16xbf16>
    %c0_1 = arith.constant 0 : index
    %c0_2 = arith.constant 0 : index
    %1 = vector.load %arg1[%c0_1, %c0_2] : memref<16x8xf32, #tpu.memory_space<vmem>>, vector<16x8xf32>
    %2 = arith.truncf %1 : vector<16x8xf32> to vector<16x8xbf16>
    %c0_3 = arith.constant 0 : index
    %c0_4 = arith.constant 0 : index
    %3 = vector.load %arg7[%c0_3, %c0_4] : memref<3x64xf32, #tpu.memory_space<vmem>>, vector<3x64xf32>
    %4 = vector.extract_strided_slice %3 {offsets = [0, 0], sizes = [1, 16], strides = [1, 1]} : vector<3x64xf32> to vector<1x16xf32>
    %5 = vector.extract_strided_slice %3 {offsets = [1, 0], sizes = [1, 64], strides = [1, 1]} : vector<3x64xf32> to vector<1x64xf32>
    %6 = vector.extract_strided_slice %3 {offsets = [2, 0], sizes = [1, 8], strides = [1, 1]} : vector<3x64xf32> to vector<1x8xf32>
    %c1 = arith.constant 1 : index
    %c0_5 = arith.constant 0 : index
    %c0_6 = arith.constant 0 : index
    %7 = vector.load %arg2[%c1, %c0_5, %c0_6] : memref<2x8x16xbf16, #tpu.memory_space<vmem>>, vector<1x8x16xbf16>
    %8 = vector.shape_cast %7 : vector<1x8x16xbf16> to vector<8x16xbf16>
    %cst = arith.constant dense<0.000000e+00> : vector<16x16xf32>
    %9 = tpu.matmul %2, %8, %cst {dimension_numbers = #tpu.dot_dimension_numbers<[1], [0], [0], [1], [0, 0, 1, 1], [], []>} : vector<16x8xbf16>, vector<8x16xbf16>, vector<16x16xf32> -> vector<16x16xf32>
    %cst_7 = arith.constant dense<0.000000e+00> : vector<16x8xf32>
    %10 = tpu.matmul %0, %2, %cst_7 {dimension_numbers = #tpu.dot_dimension_numbers<[1], [0], [0], [1], [0, 0, 1, 1], [], []>} : vector<16x16xbf16>, vector<16x8xbf16>, vector<16x8xf32> -> vector<16x8xf32>
    %11 = arith.truncf %10 : vector<16x8xf32> to vector<16x8xbf16>
    %c0_8 = arith.constant 0 : index
    %c0_9 = arith.constant 0 : index
    %c0_10 = arith.constant 0 : index
    %12 = vector.load %arg2[%c0_8, %c0_9, %c0_10] : memref<2x8x16xbf16, #tpu.memory_space<vmem>>, vector<1x8x16xbf16>
    %13 = vector.shape_cast %12 : vector<1x8x16xbf16> to vector<8x16xbf16>
    %cst_11 = arith.constant dense<0.000000e+00> : vector<16x16xf32>
    %14 = tpu.matmul %11, %13, %cst_11 {dimension_numbers = #tpu.dot_dimension_numbers<[1], [0], [0], [1], [0, 0, 1, 1], [], []>} : vector<16x8xbf16>, vector<8x16xbf16>, vector<16x16xf32> -> vector<16x16xf32>
    %15 = arith.addf %14, %9 : vector<16x16xf32>
    %16 = vector.broadcast %4 : vector<1x16xf32> to vector<16x16xf32>
    %17 = arith.addf %15, %16 : vector<16x16xf32>
    %cst_12 = arith.constant 0.000000e+00 : f32
    %18 = vector.broadcast %cst_12 : f32 to vector<16x16xf32>
    %19 = arith.maximumf %17, %18 : vector<16x16xf32>
    %20 = arith.truncf %19 : vector<16x16xf32> to vector<16x16xbf16>
    %c1_13 = arith.constant 1 : index
    %c0_14 = arith.constant 0 : index
    %c0_15 = arith.constant 0 : index
    %21 = vector.load %arg3[%c1_13, %c0_14, %c0_15] : memref<2x16x64xbf16, #tpu.memory_space<vmem>>, vector<1x16x64xbf16>
    %22 = vector.shape_cast %21 : vector<1x16x64xbf16> to vector<16x64xbf16>
    %cst_16 = arith.constant dense<0.000000e+00> : vector<16x64xf32>
    %23 = tpu.matmul %20, %22, %cst_16 {dimension_numbers = #tpu.dot_dimension_numbers<[1], [0], [0], [1], [0, 0, 1, 1], [], []>} : vector<16x16xbf16>, vector<16x64xbf16>, vector<16x64xf32> -> vector<16x64xf32>
    %cst_17 = arith.constant dense<0.000000e+00> : vector<16x16xf32>
    %24 = tpu.matmul %0, %20, %cst_17 {dimension_numbers = #tpu.dot_dimension_numbers<[1], [0], [0], [1], [0, 0, 1, 1], [], []>} : vector<16x16xbf16>, vector<16x16xbf16>, vector<16x16xf32> -> vector<16x16xf32>
    %25 = arith.truncf %24 : vector<16x16xf32> to vector<16x16xbf16>
    %c0_18 = arith.constant 0 : index
    %c0_19 = arith.constant 0 : index
    %c0_20 = arith.constant 0 : index
    %26 = vector.load %arg3[%c0_18, %c0_19, %c0_20] : memref<2x16x64xbf16, #tpu.memory_space<vmem>>, vector<1x16x64xbf16>
    %27 = vector.shape_cast %26 : vector<1x16x64xbf16> to vector<16x64xbf16>
    %cst_21 = arith.constant dense<0.000000e+00> : vector<16x64xf32>
    %28 = tpu.matmul %25, %27, %cst_21 {dimension_numbers = #tpu.dot_dimension_numbers<[1], [0], [0], [1], [0, 0, 1, 1], [], []>} : vector<16x16xbf16>, vector<16x64xbf16>, vector<16x64xf32> -> vector<16x64xf32>
    %29 = arith.addf %28, %23 : vector<16x64xf32>
    %30 = vector.broadcast %5 : vector<1x64xf32> to vector<16x64xf32>
    %31 = arith.addf %29, %30 : vector<16x64xf32>
    %cst_22 = arith.constant 0.000000e+00 : f32
    %32 = vector.broadcast %cst_22 : f32 to vector<16x64xf32>
    %33 = arith.maximumf %31, %32 : vector<16x64xf32>
    %34 = arith.truncf %33 : vector<16x64xf32> to vector<16x64xbf16>
    %c0_23 = arith.constant 0 : index
    %c0_24 = arith.constant 0 : index
    %c0_25 = arith.constant 0 : index
    %35 = vector.load %arg4[%c0_23, %c0_24, %c0_25] : memref<16x64x64xbf16, #tpu.memory_space<vmem>>, vector<1x64x64xbf16>
    %36 = vector.shape_cast %35 : vector<1x64x64xbf16> to vector<64x64xbf16>
    %cst_26 = arith.constant dense<0.000000e+00> : vector<16x64xf32>
    %37 = tpu.matmul %34, %36, %cst_26 {dimension_numbers = #tpu.dot_dimension_numbers<[1], [0], [0], [1], [0, 0, 1, 1], [], []>} : vector<16x64xbf16>, vector<64x64xbf16>, vector<16x64xf32> -> vector<16x64xf32>
    %c0_27 = arith.constant 0 : index
    %c0_28 = arith.constant 0 : index
    %c0_29 = arith.constant 0 : index
    %38 = vector.load %arg5[%c0_27, %c0_28, %c0_29] : memref<16x1x64xf32, #tpu.memory_space<vmem>>, vector<1x1x64xf32>
    %39 = vector.shape_cast %38 : vector<1x1x64xf32> to vector<1x64xf32>
    %40 = vector.broadcast %39 : vector<1x64xf32> to vector<16x64xf32>
    %41 = arith.addf %37, %40 : vector<16x64xf32>
    %cst_30 = arith.constant 0.000000e+00 : f32
    %42 = vector.broadcast %cst_30 : f32 to vector<16x64xf32>
    %43 = arith.maximumf %41, %42 : vector<16x64xf32>
    %44 = arith.truncf %43 : vector<16x64xf32> to vector<16x64xbf16>
    %c8 = arith.constant 8 : index
    %c0_31 = arith.constant 0 : index
    %c0_32 = arith.constant 0 : index
    %45 = vector.load %arg4[%c8, %c0_31, %c0_32] : memref<16x64x64xbf16, #tpu.memory_space<vmem>>, vector<1x64x64xbf16>
    %46 = vector.shape_cast %45 : vector<1x64x64xbf16> to vector<64x64xbf16>
    %cst_33 = arith.constant dense<0.000000e+00> : vector<16x64xf32>
    %47 = tpu.matmul %44, %46, %cst_33 {dimension_numbers = #tpu.dot_dimension_numbers<[1], [0], [0], [1], [0, 0, 1, 1], [], []>} : vector<16x64xbf16>, vector<64x64xbf16>, vector<16x64xf32> -> vector<16x64xf32>
    %48 = arith.addf %33, %47 : vector<16x64xf32>
    %c8_34 = arith.constant 8 : index
    %c0_35 = arith.constant 0 : index
    %c0_36 = arith.constant 0 : index
    %49 = vector.load %arg5[%c8_34, %c0_35, %c0_36] : memref<16x1x64xf32, #tpu.memory_space<vmem>>, vector<1x1x64xf32>
    %50 = vector.shape_cast %49 : vector<1x1x64xf32> to vector<1x64xf32>
    %51 = vector.broadcast %50 : vector<1x64xf32> to vector<16x64xf32>
    %52 = arith.addf %48, %51 : vector<16x64xf32>
    %cst_37 = arith.constant 0.000000e+00 : f32
    %53 = vector.broadcast %cst_37 : f32 to vector<16x64xf32>
    %54 = arith.maximumf %52, %53 : vector<16x64xf32>
    %55 = arith.truncf %54 : vector<16x64xf32> to vector<16x64xbf16>
    %c1_38 = arith.constant 1 : index
    %c0_39 = arith.constant 0 : index
    %c0_40 = arith.constant 0 : index
    %56 = vector.load %arg4[%c1_38, %c0_39, %c0_40] : memref<16x64x64xbf16, #tpu.memory_space<vmem>>, vector<1x64x64xbf16>
    %57 = vector.shape_cast %56 : vector<1x64x64xbf16> to vector<64x64xbf16>
    %cst_41 = arith.constant dense<0.000000e+00> : vector<16x64xf32>
    %58 = tpu.matmul %55, %57, %cst_41 {dimension_numbers = #tpu.dot_dimension_numbers<[1], [0], [0], [1], [0, 0, 1, 1], [], []>} : vector<16x64xbf16>, vector<64x64xbf16>, vector<16x64xf32> -> vector<16x64xf32>
    %c1_42 = arith.constant 1 : index
    %c0_43 = arith.constant 0 : index
    %c0_44 = arith.constant 0 : index
    %59 = vector.load %arg5[%c1_42, %c0_43, %c0_44] : memref<16x1x64xf32, #tpu.memory_space<vmem>>, vector<1x1x64xf32>
    %60 = vector.shape_cast %59 : vector<1x1x64xf32> to vector<1x64xf32>
    %61 = vector.broadcast %60 : vector<1x64xf32> to vector<16x64xf32>
    %62 = arith.addf %58, %61 : vector<16x64xf32>
    %cst_45 = arith.constant 0.000000e+00 : f32
    %63 = vector.broadcast %cst_45 : f32 to vector<16x64xf32>
    %64 = arith.maximumf %62, %63 : vector<16x64xf32>
    %65 = arith.truncf %64 : vector<16x64xf32> to vector<16x64xbf16>
    %c9 = arith.constant 9 : index
    %c0_46 = arith.constant 0 : index
    %c0_47 = arith.constant 0 : index
    %66 = vector.load %arg4[%c9, %c0_46, %c0_47] : memref<16x64x64xbf16, #tpu.memory_space<vmem>>, vector<1x64x64xbf16>
    %67 = vector.shape_cast %66 : vector<1x64x64xbf16> to vector<64x64xbf16>
    %cst_48 = arith.constant dense<0.000000e+00> : vector<16x64xf32>
    %68 = tpu.matmul %65, %67, %cst_48 {dimension_numbers = #tpu.dot_dimension_numbers<[1], [0], [0], [1], [0, 0, 1, 1], [], []>} : vector<16x64xbf16>, vector<64x64xbf16>, vector<16x64xf32> -> vector<16x64xf32>
    %69 = arith.addf %54, %68 : vector<16x64xf32>
    %c9_49 = arith.constant 9 : index
    %c0_50 = arith.constant 0 : index
    %c0_51 = arith.constant 0 : index
    %70 = vector.load %arg5[%c9_49, %c0_50, %c0_51] : memref<16x1x64xf32, #tpu.memory_space<vmem>>, vector<1x1x64xf32>
    %71 = vector.shape_cast %70 : vector<1x1x64xf32> to vector<1x64xf32>
    %72 = vector.broadcast %71 : vector<1x64xf32> to vector<16x64xf32>
    %73 = arith.addf %69, %72 : vector<16x64xf32>
    %cst_52 = arith.constant 0.000000e+00 : f32
    %74 = vector.broadcast %cst_52 : f32 to vector<16x64xf32>
    %75 = arith.maximumf %73, %74 : vector<16x64xf32>
    %76 = arith.truncf %75 : vector<16x64xf32> to vector<16x64xbf16>
    %c2 = arith.constant 2 : index
    %c0_53 = arith.constant 0 : index
    %c0_54 = arith.constant 0 : index
    %77 = vector.load %arg4[%c2, %c0_53, %c0_54] : memref<16x64x64xbf16, #tpu.memory_space<vmem>>, vector<1x64x64xbf16>
    %78 = vector.shape_cast %77 : vector<1x64x64xbf16> to vector<64x64xbf16>
    %cst_55 = arith.constant dense<0.000000e+00> : vector<16x64xf32>
    %79 = tpu.matmul %76, %78, %cst_55 {dimension_numbers = #tpu.dot_dimension_numbers<[1], [0], [0], [1], [0, 0, 1, 1], [], []>} : vector<16x64xbf16>, vector<64x64xbf16>, vector<16x64xf32> -> vector<16x64xf32>
    %c2_56 = arith.constant 2 : index
    %c0_57 = arith.constant 0 : index
    %c0_58 = arith.constant 0 : index
    %80 = vector.load %arg5[%c2_56, %c0_57, %c0_58] : memref<16x1x64xf32, #tpu.memory_space<vmem>>, vector<1x1x64xf32>
    %81 = vector.shape_cast %80 : vector<1x1x64xf32> to vector<1x64xf32>
    %82 = vector.broadcast %81 : vector<1x64xf32> to vector<16x64xf32>
    %83 = arith.addf %79, %82 : vector<16x64xf32>
    %cst_59 = arith.constant 0.000000e+00 : f32
    %84 = vector.broadcast %cst_59 : f32 to vector<16x64xf32>
    %85 = arith.maximumf %83, %84 : vector<16x64xf32>
    %86 = arith.truncf %85 : vector<16x64xf32> to vector<16x64xbf16>
    %c10 = arith.constant 10 : index
    %c0_60 = arith.constant 0 : index
    %c0_61 = arith.constant 0 : index
    %87 = vector.load %arg4[%c10, %c0_60, %c0_61] : memref<16x64x64xbf16, #tpu.memory_space<vmem>>, vector<1x64x64xbf16>
    %88 = vector.shape_cast %87 : vector<1x64x64xbf16> to vector<64x64xbf16>
    %cst_62 = arith.constant dense<0.000000e+00> : vector<16x64xf32>
    %89 = tpu.matmul %86, %88, %cst_62 {dimension_numbers = #tpu.dot_dimension_numbers<[1], [0], [0], [1], [0, 0, 1, 1], [], []>} : vector<16x64xbf16>, vector<64x64xbf16>, vector<16x64xf32> -> vector<16x64xf32>
    %90 = arith.addf %75, %89 : vector<16x64xf32>
    %c10_63 = arith.constant 10 : index
    %c0_64 = arith.constant 0 : index
    %c0_65 = arith.constant 0 : index
    %91 = vector.load %arg5[%c10_63, %c0_64, %c0_65] : memref<16x1x64xf32, #tpu.memory_space<vmem>>, vector<1x1x64xf32>
    %92 = vector.shape_cast %91 : vector<1x1x64xf32> to vector<1x64xf32>
    %93 = vector.broadcast %92 : vector<1x64xf32> to vector<16x64xf32>
    %94 = arith.addf %90, %93 : vector<16x64xf32>
    %cst_66 = arith.constant 0.000000e+00 : f32
    %95 = vector.broadcast %cst_66 : f32 to vector<16x64xf32>
    %96 = arith.maximumf %94, %95 : vector<16x64xf32>
    %97 = arith.truncf %96 : vector<16x64xf32> to vector<16x64xbf16>
    %c3 = arith.constant 3 : index
    %c0_67 = arith.constant 0 : index
    %c0_68 = arith.constant 0 : index
    %98 = vector.load %arg4[%c3, %c0_67, %c0_68] : memref<16x64x64xbf16, #tpu.memory_space<vmem>>, vector<1x64x64xbf16>
    %99 = vector.shape_cast %98 : vector<1x64x64xbf16> to vector<64x64xbf16>
    %cst_69 = arith.constant dense<0.000000e+00> : vector<16x64xf32>
    %100 = tpu.matmul %97, %99, %cst_69 {dimension_numbers = #tpu.dot_dimension_numbers<[1], [0], [0], [1], [0, 0, 1, 1], [], []>} : vector<16x64xbf16>, vector<64x64xbf16>, vector<16x64xf32> -> vector<16x64xf32>
    %c3_70 = arith.constant 3 : index
    %c0_71 = arith.constant 0 : index
    %c0_72 = arith.constant 0 : index
    %101 = vector.load %arg5[%c3_70, %c0_71, %c0_72] : memref<16x1x64xf32, #tpu.memory_space<vmem>>, vector<1x1x64xf32>
    %102 = vector.shape_cast %101 : vector<1x1x64xf32> to vector<1x64xf32>
    %103 = vector.broadcast %102 : vector<1x64xf32> to vector<16x64xf32>
    %104 = arith.addf %100, %103 : vector<16x64xf32>
    %cst_73 = arith.constant 0.000000e+00 : f32
    %105 = vector.broadcast %cst_73 : f32 to vector<16x64xf32>
    %106 = arith.maximumf %104, %105 : vector<16x64xf32>
    %107 = arith.truncf %106 : vector<16x64xf32> to vector<16x64xbf16>
    %c11 = arith.constant 11 : index
    %c0_74 = arith.constant 0 : index
    %c0_75 = arith.constant 0 : index
    %108 = vector.load %arg4[%c11, %c0_74, %c0_75] : memref<16x64x64xbf16, #tpu.memory_space<vmem>>, vector<1x64x64xbf16>
    %109 = vector.shape_cast %108 : vector<1x64x64xbf16> to vector<64x64xbf16>
    %cst_76 = arith.constant dense<0.000000e+00> : vector<16x64xf32>
    %110 = tpu.matmul %107, %109, %cst_76 {dimension_numbers = #tpu.dot_dimension_numbers<[1], [0], [0], [1], [0, 0, 1, 1], [], []>} : vector<16x64xbf16>, vector<64x64xbf16>, vector<16x64xf32> -> vector<16x64xf32>
    %111 = arith.addf %96, %110 : vector<16x64xf32>
    %c11_77 = arith.constant 11 : index
    %c0_78 = arith.constant 0 : index
    %c0_79 = arith.constant 0 : index
    %112 = vector.load %arg5[%c11_77, %c0_78, %c0_79] : memref<16x1x64xf32, #tpu.memory_space<vmem>>, vector<1x1x64xf32>
    %113 = vector.shape_cast %112 : vector<1x1x64xf32> to vector<1x64xf32>
    %114 = vector.broadcast %113 : vector<1x64xf32> to vector<16x64xf32>
    %115 = arith.addf %111, %114 : vector<16x64xf32>
    %cst_80 = arith.constant 0.000000e+00 : f32
    %116 = vector.broadcast %cst_80 : f32 to vector<16x64xf32>
    %117 = arith.maximumf %115, %116 : vector<16x64xf32>
    %118 = arith.truncf %117 : vector<16x64xf32> to vector<16x64xbf16>
    %c4 = arith.constant 4 : index
    %c0_81 = arith.constant 0 : index
    %c0_82 = arith.constant 0 : index
    %119 = vector.load %arg4[%c4, %c0_81, %c0_82] : memref<16x64x64xbf16, #tpu.memory_space<vmem>>, vector<1x64x64xbf16>
    %120 = vector.shape_cast %119 : vector<1x64x64xbf16> to vector<64x64xbf16>
    %cst_83 = arith.constant dense<0.000000e+00> : vector<16x64xf32>
    %121 = tpu.matmul %118, %120, %cst_83 {dimension_numbers = #tpu.dot_dimension_numbers<[1], [0], [0], [1], [0, 0, 1, 1], [], []>} : vector<16x64xbf16>, vector<64x64xbf16>, vector<16x64xf32> -> vector<16x64xf32>
    %c4_84 = arith.constant 4 : index
    %c0_85 = arith.constant 0 : index
    %c0_86 = arith.constant 0 : index
    %122 = vector.load %arg5[%c4_84, %c0_85, %c0_86] : memref<16x1x64xf32, #tpu.memory_space<vmem>>, vector<1x1x64xf32>
    %123 = vector.shape_cast %122 : vector<1x1x64xf32> to vector<1x64xf32>
    %124 = vector.broadcast %123 : vector<1x64xf32> to vector<16x64xf32>
    %125 = arith.addf %121, %124 : vector<16x64xf32>
    %cst_87 = arith.constant 0.000000e+00 : f32
    %126 = vector.broadcast %cst_87 : f32 to vector<16x64xf32>
    %127 = arith.maximumf %125, %126 : vector<16x64xf32>
    %128 = arith.truncf %127 : vector<16x64xf32> to vector<16x64xbf16>
    %c12 = arith.constant 12 : index
    %c0_88 = arith.constant 0 : index
    %c0_89 = arith.constant 0 : index
    %129 = vector.load %arg4[%c12, %c0_88, %c0_89] : memref<16x64x64xbf16, #tpu.memory_space<vmem>>, vector<1x64x64xbf16>
    %130 = vector.shape_cast %129 : vector<1x64x64xbf16> to vector<64x64xbf16>
    %cst_90 = arith.constant dense<0.000000e+00> : vector<16x64xf32>
    %131 = tpu.matmul %128, %130, %cst_90 {dimension_numbers = #tpu.dot_dimension_numbers<[1], [0], [0], [1], [0, 0, 1, 1], [], []>} : vector<16x64xbf16>, vector<64x64xbf16>, vector<16x64xf32> -> vector<16x64xf32>
    %132 = arith.addf %117, %131 : vector<16x64xf32>
    %c12_91 = arith.constant 12 : index
    %c0_92 = arith.constant 0 : index
    %c0_93 = arith.constant 0 : index
    %133 = vector.load %arg5[%c12_91, %c0_92, %c0_93] : memref<16x1x64xf32, #tpu.memory_space<vmem>>, vector<1x1x64xf32>
    %134 = vector.shape_cast %133 : vector<1x1x64xf32> to vector<1x64xf32>
    %135 = vector.broadcast %134 : vector<1x64xf32> to vector<16x64xf32>
    %136 = arith.addf %132, %135 : vector<16x64xf32>
    %cst_94 = arith.constant 0.000000e+00 : f32
    %137 = vector.broadcast %cst_94 : f32 to vector<16x64xf32>
    %138 = arith.maximumf %136, %137 : vector<16x64xf32>
    %139 = arith.truncf %138 : vector<16x64xf32> to vector<16x64xbf16>
    %c5 = arith.constant 5 : index
    %c0_95 = arith.constant 0 : index
    %c0_96 = arith.constant 0 : index
    %140 = vector.load %arg4[%c5, %c0_95, %c0_96] : memref<16x64x64xbf16, #tpu.memory_space<vmem>>, vector<1x64x64xbf16>
    %141 = vector.shape_cast %140 : vector<1x64x64xbf16> to vector<64x64xbf16>
    %cst_97 = arith.constant dense<0.000000e+00> : vector<16x64xf32>
    %142 = tpu.matmul %139, %141, %cst_97 {dimension_numbers = #tpu.dot_dimension_numbers<[1], [0], [0], [1], [0, 0, 1, 1], [], []>} : vector<16x64xbf16>, vector<64x64xbf16>, vector<16x64xf32> -> vector<16x64xf32>
    %c5_98 = arith.constant 5 : index
    %c0_99 = arith.constant 0 : index
    %c0_100 = arith.constant 0 : index
    %143 = vector.load %arg5[%c5_98, %c0_99, %c0_100] : memref<16x1x64xf32, #tpu.memory_space<vmem>>, vector<1x1x64xf32>
    %144 = vector.shape_cast %143 : vector<1x1x64xf32> to vector<1x64xf32>
    %145 = vector.broadcast %144 : vector<1x64xf32> to vector<16x64xf32>
    %146 = arith.addf %142, %145 : vector<16x64xf32>
    %cst_101 = arith.constant 0.000000e+00 : f32
    %147 = vector.broadcast %cst_101 : f32 to vector<16x64xf32>
    %148 = arith.maximumf %146, %147 : vector<16x64xf32>
    %149 = arith.truncf %148 : vector<16x64xf32> to vector<16x64xbf16>
    %c13 = arith.constant 13 : index
    %c0_102 = arith.constant 0 : index
    %c0_103 = arith.constant 0 : index
    %150 = vector.load %arg4[%c13, %c0_102, %c0_103] : memref<16x64x64xbf16, #tpu.memory_space<vmem>>, vector<1x64x64xbf16>
    %151 = vector.shape_cast %150 : vector<1x64x64xbf16> to vector<64x64xbf16>
    %cst_104 = arith.constant dense<0.000000e+00> : vector<16x64xf32>
    %152 = tpu.matmul %149, %151, %cst_104 {dimension_numbers = #tpu.dot_dimension_numbers<[1], [0], [0], [1], [0, 0, 1, 1], [], []>} : vector<16x64xbf16>, vector<64x64xbf16>, vector<16x64xf32> -> vector<16x64xf32>
    %153 = arith.addf %138, %152 : vector<16x64xf32>
    %c13_105 = arith.constant 13 : index
    %c0_106 = arith.constant 0 : index
    %c0_107 = arith.constant 0 : index
    %154 = vector.load %arg5[%c13_105, %c0_106, %c0_107] : memref<16x1x64xf32, #tpu.memory_space<vmem>>, vector<1x1x64xf32>
    %155 = vector.shape_cast %154 : vector<1x1x64xf32> to vector<1x64xf32>
    %156 = vector.broadcast %155 : vector<1x64xf32> to vector<16x64xf32>
    %157 = arith.addf %153, %156 : vector<16x64xf32>
    %cst_108 = arith.constant 0.000000e+00 : f32
    %158 = vector.broadcast %cst_108 : f32 to vector<16x64xf32>
    %159 = arith.maximumf %157, %158 : vector<16x64xf32>
    %160 = arith.truncf %159 : vector<16x64xf32> to vector<16x64xbf16>
    %c6 = arith.constant 6 : index
    %c0_109 = arith.constant 0 : index
    %c0_110 = arith.constant 0 : index
    %161 = vector.load %arg4[%c6, %c0_109, %c0_110] : memref<16x64x64xbf16, #tpu.memory_space<vmem>>, vector<1x64x64xbf16>
    %162 = vector.shape_cast %161 : vector<1x64x64xbf16> to vector<64x64xbf16>
    %cst_111 = arith.constant dense<0.000000e+00> : vector<16x64xf32>
    %163 = tpu.matmul %160, %162, %cst_111 {dimension_numbers = #tpu.dot_dimension_numbers<[1], [0], [0], [1], [0, 0, 1, 1], [], []>} : vector<16x64xbf16>, vector<64x64xbf16>, vector<16x64xf32> -> vector<16x64xf32>
    %c6_112 = arith.constant 6 : index
    %c0_113 = arith.constant 0 : index
    %c0_114 = arith.constant 0 : index
    %164 = vector.load %arg5[%c6_112, %c0_113, %c0_114] : memref<16x1x64xf32, #tpu.memory_space<vmem>>, vector<1x1x64xf32>
    %165 = vector.shape_cast %164 : vector<1x1x64xf32> to vector<1x64xf32>
    %166 = vector.broadcast %165 : vector<1x64xf32> to vector<16x64xf32>
    %167 = arith.addf %163, %166 : vector<16x64xf32>
    %cst_115 = arith.constant 0.000000e+00 : f32
    %168 = vector.broadcast %cst_115 : f32 to vector<16x64xf32>
    %169 = arith.maximumf %167, %168 : vector<16x64xf32>
    %170 = arith.truncf %169 : vector<16x64xf32> to vector<16x64xbf16>
    %c14 = arith.constant 14 : index
    %c0_116 = arith.constant 0 : index
    %c0_117 = arith.constant 0 : index
    %171 = vector.load %arg4[%c14, %c0_116, %c0_117] : memref<16x64x64xbf16, #tpu.memory_space<vmem>>, vector<1x64x64xbf16>
    %172 = vector.shape_cast %171 : vector<1x64x64xbf16> to vector<64x64xbf16>
    %cst_118 = arith.constant dense<0.000000e+00> : vector<16x64xf32>
    %173 = tpu.matmul %170, %172, %cst_118 {dimension_numbers = #tpu.dot_dimension_numbers<[1], [0], [0], [1], [0, 0, 1, 1], [], []>} : vector<16x64xbf16>, vector<64x64xbf16>, vector<16x64xf32> -> vector<16x64xf32>
    %174 = arith.addf %159, %173 : vector<16x64xf32>
    %c14_119 = arith.constant 14 : index
    %c0_120 = arith.constant 0 : index
    %c0_121 = arith.constant 0 : index
    %175 = vector.load %arg5[%c14_119, %c0_120, %c0_121] : memref<16x1x64xf32, #tpu.memory_space<vmem>>, vector<1x1x64xf32>
    %176 = vector.shape_cast %175 : vector<1x1x64xf32> to vector<1x64xf32>
    %177 = vector.broadcast %176 : vector<1x64xf32> to vector<16x64xf32>
    %178 = arith.addf %174, %177 : vector<16x64xf32>
    %cst_122 = arith.constant 0.000000e+00 : f32
    %179 = vector.broadcast %cst_122 : f32 to vector<16x64xf32>
    %180 = arith.maximumf %178, %179 : vector<16x64xf32>
    %181 = arith.truncf %180 : vector<16x64xf32> to vector<16x64xbf16>
    %c7 = arith.constant 7 : index
    %c0_123 = arith.constant 0 : index
    %c0_124 = arith.constant 0 : index
    %182 = vector.load %arg4[%c7, %c0_123, %c0_124] : memref<16x64x64xbf16, #tpu.memory_space<vmem>>, vector<1x64x64xbf16>
    %183 = vector.shape_cast %182 : vector<1x64x64xbf16> to vector<64x64xbf16>
    %cst_125 = arith.constant dense<0.000000e+00> : vector<16x64xf32>
    %184 = tpu.matmul %181, %183, %cst_125 {dimension_numbers = #tpu.dot_dimension_numbers<[1], [0], [0], [1], [0, 0, 1, 1], [], []>} : vector<16x64xbf16>, vector<64x64xbf16>, vector<16x64xf32> -> vector<16x64xf32>
    %c7_126 = arith.constant 7 : index
    %c0_127 = arith.constant 0 : index
    %c0_128 = arith.constant 0 : index
    %185 = vector.load %arg5[%c7_126, %c0_127, %c0_128] : memref<16x1x64xf32, #tpu.memory_space<vmem>>, vector<1x1x64xf32>
    %186 = vector.shape_cast %185 : vector<1x1x64xf32> to vector<1x64xf32>
    %187 = vector.broadcast %186 : vector<1x64xf32> to vector<16x64xf32>
    %188 = arith.addf %184, %187 : vector<16x64xf32>
    %cst_129 = arith.constant 0.000000e+00 : f32
    %189 = vector.broadcast %cst_129 : f32 to vector<16x64xf32>
    %190 = arith.maximumf %188, %189 : vector<16x64xf32>
    %191 = arith.truncf %190 : vector<16x64xf32> to vector<16x64xbf16>
    %c15 = arith.constant 15 : index
    %c0_130 = arith.constant 0 : index
    %c0_131 = arith.constant 0 : index
    %192 = vector.load %arg4[%c15, %c0_130, %c0_131] : memref<16x64x64xbf16, #tpu.memory_space<vmem>>, vector<1x64x64xbf16>
    %193 = vector.shape_cast %192 : vector<1x64x64xbf16> to vector<64x64xbf16>
    %cst_132 = arith.constant dense<0.000000e+00> : vector<16x64xf32>
    %194 = tpu.matmul %191, %193, %cst_132 {dimension_numbers = #tpu.dot_dimension_numbers<[1], [0], [0], [1], [0, 0, 1, 1], [], []>} : vector<16x64xbf16>, vector<64x64xbf16>, vector<16x64xf32> -> vector<16x64xf32>
    %195 = arith.addf %180, %194 : vector<16x64xf32>
    %c15_133 = arith.constant 15 : index
    %c0_134 = arith.constant 0 : index
    %c0_135 = arith.constant 0 : index
    %196 = vector.load %arg5[%c15_133, %c0_134, %c0_135] : memref<16x1x64xf32, #tpu.memory_space<vmem>>, vector<1x1x64xf32>
    %197 = vector.shape_cast %196 : vector<1x1x64xf32> to vector<1x64xf32>
    %198 = vector.broadcast %197 : vector<1x64xf32> to vector<16x64xf32>
    %199 = arith.addf %195, %198 : vector<16x64xf32>
    %cst_136 = arith.constant 0.000000e+00 : f32
    %200 = vector.broadcast %cst_136 : f32 to vector<16x64xf32>
    %201 = arith.maximumf %199, %200 : vector<16x64xf32>
    %202 = arith.truncf %201 : vector<16x64xf32> to vector<16x64xbf16>
    %c0_137 = arith.constant 0 : index
    %c0_138 = arith.constant 0 : index
    %203 = vector.load %arg6[%c0_137, %c0_138] : memref<64x8xbf16, #tpu.memory_space<vmem>>, vector<64x8xbf16>
    %cst_139 = arith.constant dense<0.000000e+00> : vector<16x8xf32>
    %204 = tpu.matmul %202, %203, %cst_139 {dimension_numbers = #tpu.dot_dimension_numbers<[1], [0], [0], [1], [0, 0, 1, 1], [], []>} : vector<16x64xbf16>, vector<64x8xbf16>, vector<16x8xf32> -> vector<16x8xf32>
    %205 = vector.broadcast %6 : vector<1x8xf32> to vector<16x8xf32>
    %206 = arith.addf %204, %205 : vector<16x8xf32>
    %c0_140 = arith.constant 0 : index
    %c0_141 = arith.constant 0 : index
    %207 = vector.load %arg8[%c0_140, %c0_141] : memref<16x8xf32, #tpu.memory_space<vmem>>, vector<16x8xf32>
    tpu.vector_store %arg8[%c0_140, %c0_141], %206 {strides = array<i32>} : memref<16x8xf32, #tpu.memory_space<vmem>>, vector<16x8xf32>,
    return
  }
}

</mosaic_0001>

<bundles_post_ra>
// kernel: forward.1
= control target key start
LH: loop header
LB: loop body
LE: loop exit
PB: predicated region body
PF: predicated region fallthrough
CT: control target
= control target key end

     0   :  { %13 = vsyncpa [#allocation3], 0  ;;  %s1656_s30 = smov [#allocation2]   ;;  %s1657_s10 = smov 64   ;;  %s1827_s0 = inlined_call_operand.vmem [shape: bf16[16,16], index: 0, kind: input, shape index: {}]   ;;  %s1828_s1 = inlined_call_operand.vmem [shape: f32[16,8], index: 1, kind: input, shape index: {}]   ;;  %s1829_s2 = inlined_call_operand.vmem [shape: bf16[2,8,16], index: 2, kind: input, shape index: {}]   ;;  %s1830_s3 = inlined_call_operand.vmem [shape: bf16[2,16,64], index: 3, kind: input, shape index: {}]   ;;  %s1831_s4 = inlined_call_operand.hbm [shape: bf16[16,64,64], index: 4, kind: input, shape index: {}]   ;;  %s1832_s5 = inlined_call_operand.vmem [shape: f32[16,1,64], index: 5, kind: input, shape index: {}]   ;;  %s1833_s6 = inlined_call_operand.vmem [shape: bf16[64,8], index: 6, kind: input, shape index: {}]   ;;  %s1834_s7 = inlined_call_operand.vmem [shape: f32[3,64], index: 7, kind: input, shape index: {}]   ;;  %s1835_s8 = inlined_call_operand.vmem [shape: f32[16,8], index: 8, kind: output, shape index: {}]  }
   0x1   :  { %s26_s29 = sshll.u32 %s1831_s4, 4  ;;  %s28_s9 = sshll.u32 %s1656_s30, 4  ;;  %s27_s29 = int_to_ptr.hbm [resolvable:$true] %s26_s29  ;;  %s29_s9 = int_to_ptr.vmem [resolvable:$true] %s28_s9 }
   0x2   :  { %s1658_s11 = smov 4  }
   0x3   :  { %34 = dma.hbm_to_vmem [thread:$0]  %s27_s29, 8192, %s29_s9, [#allocation3], %s1657_s10, %s1657_s10, %s1658_s11  }
   0x4   :  { %1654 = dma.done.wait [#allocation3], 8192  }
   0x5   :  { %1655 = vsyncadd [#allocation3], 4294959104  ;;  %v48_v0 = vld [vmem:[%s1828_s1] sm:$0xff]  ;;  %v49_v1 = vld [vmem:[%s1828_s1 + $0x8] sm:$0xff]  ;;  %vm81_vm0 = vcmask 130048   ;;  %vm58_vm1 = vcmask 1043456  }
   0x6   :  { %v1540_v2 = vld [vmem:[%s1827_s0] sm:$0xff]  ;;  %v50_v3 = vpack.c.bf16 %v49_v1, %v48_v0  ;;  %vm54_vm2 = vcmask 64512   ;;  %v1541_v11 = vld [vmem:[%s1830_s3 + $0x8] sm:$0xff]  ;;  %v1546_v29 = vld [vmem:[#allocation2 + $0x18] sm:$0xff]  ;;  %vm235_vm3 = vcmask 523264  }
   0x7   :  { %v1215_v4 = vld [vmem:[%s1829_s2 + $0x4] sm:$0xf]  ;;  %v100_v6 = vld [vmem:[%s1829_s2] sm:$0xf]  ;;  %146 = vmatpush.bf16.msra.mxu3 %v1541_v11  ;;  %v1545_v30 = vld [vmem:[#allocation2 + $0x10] sm:$0xff] }
   0x8   :  { %92 = vmatpush.bf16.msra.mxu1 %v50_v3  ;;  %v60_v5 = vsel %vm58_vm1, %v1215_v4, 0  ;;  %v105_v7 = vsel %vm58_vm1, %v100_v6, 0  ;;  %v1731_v14 = vld [vmem:[%s1834_s7] sm:$0x7]  ;;  %v1544_v31 = vld [vmem:[#allocation2 + $0x8] sm:$0xff]  ;;  %v1550_v45 = vld [vmem:[#allocation2 + $0x118] sm:$0xff] }
   0x9   :  { %69 = vmatpush.bf16.msra.mxu0 %v60_v5  ;;  %114 = vmatpush.bf16.msra.mxu2 %v105_v7  ;;  %v121_v16 = vperm.slane %v1731_v14, 0  ;;  %v1542_v25 = vld [vmem:[%s1830_s3] sm:$0xff]  ;;  %v193_v36 = vperm.slane %v1731_v14, 1  ;;  %v1549_v46 = vld [vmem:[#allocation2 + $0x110] sm:$0xff]  ;;  %v1548_v47 = vld [vmem:[#allocation2 + $0x108] sm:$0xff] }
   0xa   :  { %v1543_v32 = vld [vmem:[#allocation2] sm:$0xff]  ;;  %v1554_v57 = vld [vmem:[#allocation2 + $0x38] sm:$0xff]  ;;  %v1553_v58 = vld [vmem:[#allocation2 + $0x30] sm:$0xff] }
   0xb   :  { %1221 = vmatmul.msk.bf16.vlgmr.msra.gmra.mxu1 %vm81_vm0, %v1540_v2  ;;  %296 = vmatpush.bf16.msrb.mxu3 %v1550_v45  ;;  %v1547_v48 = vld [vmem:[#allocation2 + $0x100] sm:$0xff]  ;;  %v1552_v59 = vld [vmem:[#allocation2 + $0x28] sm:$0xff]  ;;  %v1558_v7 = vld [vmem:[#allocation2 + $0x138] sm:$0xff] }
   0xc   :  { %1216 = vmatmul.msk.bf16.vlgmr.msra.gmra.mxu0 %vm54_vm2, %v50_v3  ;;  %186 = vmatpush.bf16.msrb.mxu1 %v1542_v25  ;;  %v1614_v50 = vld [vmem:[%s1832_s5] ss:$0 sm:$0xff]  ;;  %v1615_v63 = vld [vmem:[%s1832_s5 + $0x8] ss:$0 sm:$0xff] }
   0xd   :  { %243 = vmatpush.bf16.msrb.mxu2 %v1546_v29  ;;  %v1551_v60 = vld [vmem:[#allocation2 + $0x20] sm:$0xff] }
   0xf   :  { %297 = vmatpush.bf16.msrb.mxu3 %v1549_v46  ;;  %v1570_v46 = vld [vmem:[#allocation2 + $0x78] sm:$0xff] }
  0x10   :  { %416 = vmatpush.bf16.msra.mxu1 %v1558_v7 }
  0x11   :  { %244 = vmatpush.bf16.msrb.mxu2 %v1545_v30 }
  0x13   :  { %298 = vmatpush.bf16.msrb.mxu3 %v1548_v47  ;;  %v1569_v47 = vld [vmem:[#allocation2 + $0x70] sm:$0xff] }
  0x15   :  { %245 = vmatpush.bf16.msrb.mxu2 %v1544_v31 }
  0x17   :  { %299 = vmatpush.bf16.msrb.mxu3 %v1547_v48  ;;  %v1568_v48 = vld [vmem:[#allocation2 + $0x68] sm:$0xff] }
  0x19   :  { %246 = vmatpush.bf16.msrb.mxu2 %v1543_v32 }
  0x88   :  { %v94_v8 = vpop.f32.mrf.mxu1 }
  0x89   :  { %v71_v12 = vpop.f32.mrf.mxu0 }
  0x90   :  { %v96_v9 = vpop.f32.mrf.mxu1 }
  0x91   :  { %v99_v10 = vpack.c.bf16 %v96_v9, %v94_v8  ;;  %v73_v17 = vpop.f32.mrf.mxu0  ;;  %v1557_v8 = vld [vmem:[#allocation2 + $0x130] sm:$0xff]  ;;  %v1556_v9 = vld [vmem:[#allocation2 + $0x128] sm:$0xff] }
  0x92   :  { %417 = vmatpush.bf16.msra.mxu1 %v1557_v8  ;;  %v1578_v8 = vld [vmem:[#allocation2 + $0x98] sm:$0xff] }
  0x93   :  { %1222 = vmatmul.msk.bf16.vlgmr.msra.gmra.mxu2 %vm54_vm2, %v99_v10  ;;  %v1555_v10 = vld [vmem:[#allocation2 + $0x120] sm:$0xff] }
  0x96   :  { %418 = vmatpush.bf16.msra.mxu1 %v1556_v9  ;;  %v1577_v9 = vld [vmem:[#allocation2 + $0x90] sm:$0xff] }
  0x9a   :  { %419 = vmatpush.bf16.msra.mxu1 %v1555_v10  ;;  %v1576_v10 = vld [vmem:[#allocation2 + $0x88] sm:$0xff] }
 0x116   :  { %v116_v13 = vpop.f32.mrf.mxu2 }
 0x117   :  { %v117_v15 = vadd.f32 %v116_v13, %v71_v12  ;;  %v1616_v12 = vld [vmem:[%s1832_s5 + $0x1] ss:$0 sm:$0xff] }
 0x119   :  { %v122_v19 = vadd.f32 %v121_v16, %v117_v15 }
 0x11b   :  { %v124_v22 = vmax.f32 %v122_v19, 0.0 }
 0x11e   :  { %v118_v18 = vpop.f32.mrf.mxu2 }
 0x11f   :  { %v119_v20 = vadd.f32 %v118_v18, %v73_v17 }
 0x121   :  { %v123_v21 = vadd.f32 %v121_v16, %v119_v20  ;;  %v1562_v20 = vld [vmem:[#allocation2 + $0x58] sm:$0xff] }
 0x122   :  { %483 = vmatpush.bf16.msra.mxu2 %v1562_v20 }
 0x123   :  { %v125_v23 = vmax.f32 %v123_v21, 0.0  ;;  %v1561_v21 = vld [vmem:[#allocation2 + $0x50] sm:$0xff] }
 0x125   :  { %v126_v24 = vpack.c.bf16 %v125_v23, %v124_v22  ;;  %v1560_v22 = vld [vmem:[#allocation2 + $0x48] sm:$0xff]  ;;  %v1559_v23 = vld [vmem:[#allocation2 + $0x40] sm:$0xff] }
 0x126   :  { %484 = vmatpush.bf16.msra.mxu2 %v1561_v21 }
 0x127   :  { %1229 = vmatmul.msk.bf16.vlgmr.msra.gmra.mxu3 %vm81_vm0, %v126_v24  ;;  %160 = vmatpush.bf16.msrb.mxu0 %v126_v24 }
 0x12a   :  { %1230 = vmatmul.msk.bf16.vlgmr.msrb.gmra.mxu0 %vm81_vm0, %v1540_v2  ;;  %485 = vmatpush.bf16.msra.mxu2 %v1560_v22 }
 0x12b   :  { %363 = vmatpush.bf16.msra.mxu0 %v1554_v57 }
 0x12e   :  { %486 = vmatpush.bf16.msra.mxu2 %v1559_v23  ;;  %v1582_v23 = vld [vmem:[#allocation2 + $0x198] sm:$0xff] }
 0x12f   :  { %364 = vmatpush.bf16.msra.mxu0 %v1553_v58 }
 0x133   :  { %365 = vmatpush.bf16.msra.mxu0 %v1552_v59 }
 0x137   :  { %366 = vmatpush.bf16.msra.mxu0 %v1551_v60  ;;  %v1574_v60 = vld [vmem:[#allocation2 + $0x178] sm:$0xff] }
 0x13b   :  { %603 = vmatpush.bf16.msrb.mxu0 %v1570_v46 }
 0x13f   :  { %604 = vmatpush.bf16.msrb.mxu0 %v1569_v47 }
 0x143   :  { %605 = vmatpush.bf16.msrb.mxu0 %v1568_v48 }
 0x1a7   :  { %v162_v26 = vpop.f32.mrf.mxu0 }
 0x1aa   :  { %v148_v33 = vpop.f32.mrf.mxu3 }
 0x1af   :  { %v164_v27 = vpop.f32.mrf.mxu0 }
 0x1b0   :  { %v167_v28 = vpack.c.bf16 %v164_v27, %v162_v26  ;;  %v1617_v26 = vld [vmem:[%s1832_s5 + $0x9] ss:$0 sm:$0xff] }
 0x1b2   :  { %1235 = vmatmul.msk.bf16.vlgmr.msrb.gmra.mxu1 %vm81_vm0, %v167_v28  ;;  %v150_v37 = vpop.f32.mrf.mxu3 }
 0x1b3   :  { %656 = vmatpush.bf16.msrb.mxu1 %v1574_v60 }
 0x22f   :  { %v188_v34 = vpop.f32.mrf.mxu1 }
 0x230   :  { %v189_v35 = vadd.f32 %v188_v34, %v148_v33  ;;  %v1566_v34 = vld [vmem:[#allocation2 + $0x158] sm:$0xff] }
 0x231   :  { %536 = vmatpush.bf16.msra.mxu3 %v1566_v34 }
 0x232   :  { %v194_v39 = vadd.f32 %v193_v36, %v189_v35  ;;  %v1565_v35 = vld [vmem:[#allocation2 + $0x150] sm:$0xff] }
 0x234   :  { %v196_v42 = vmax.f32 %v194_v39, 0.0  ;;  %v1618_v39 = vld [vmem:[%s1832_s5 + $0x2] ss:$0 sm:$0xff] }
 0x235   :  { %537 = vmatpush.bf16.msra.mxu3 %v1565_v35  ;;  %v1586_v35 = vld [vmem:[#allocation2 + $0xb8] sm:$0xff] }
 0x237   :  { %v190_v38 = vpop.f32.mrf.mxu1 }
 0x238   :  { %v191_v40 = vadd.f32 %v190_v38, %v150_v37  ;;  %v1563_v37 = vld [vmem:[#allocation2 + $0x140] sm:$0xff] }
 0x23a   :  { %v195_v41 = vadd.f32 %v193_v36, %v191_v40  ;;  %v1564_v36 = vld [vmem:[#allocation2 + $0x148] sm:$0xff] }
 0x23b   :  { %538 = vmatpush.bf16.msra.mxu3 %v1564_v36  ;;  %v1585_v36 = vld [vmem:[#allocation2 + $0xb0] sm:$0xff] }
 0x23c   :  { %v197_v43 = vmax.f32 %v195_v41, 0.0 }
 0x23e   :  { %v198_v44 = vpack.c.bf16 %v197_v43, %v196_v42 }
 0x23f   :  { %539 = vmatpush.bf16.msra.mxu3 %v1563_v37  ;;  %v1584_v37 = vld [vmem:[#allocation2 + $0xa8] sm:$0xff] }
 0x240   :  { %1252 = vmatmul.msk.bf16.vlgmr.msrb.gmra.mxu2 %vm235_vm3, %v198_v44 }
 0x241   :  { %723 = vmatpush.bf16.msrb.mxu2 %v1578_v8 }
 0x245   :  { %724 = vmatpush.bf16.msrb.mxu2 %v1577_v9 }
 0x249   :  { %725 = vmatpush.bf16.msrb.mxu2 %v1576_v10 }
 0x2c3   :  { %v248_v49 = vpop.f32.mrf.mxu2 }
 0x2c4   :  { %v249_v51 = vadd.f32 %v1614_v50, %v248_v49  ;;  %v1567_v49 = vld [vmem:[#allocation2 + $0x60] sm:$0xff] }
 0x2c5   :  { %606 = vmatpush.bf16.msrb.mxu0 %v1567_v49  ;;  %v1590_v49 = vld [vmem:[#allocation2 + $0x1b8] sm:$0xff] }
 0x2c6   :  { %v253_v54 = vmax.f32 %v249_v51, 0.0 }
 0x2cb   :  { %v250_v52 = vpop.f32.mrf.mxu2 }
 0x2cc   :  { %v251_v53 = vadd.f32 %v1614_v50, %v250_v52  ;;  %v1619_v52 = vld [vmem:[%s1832_s5 + $0xa] ss:$0 sm:$0xff] }
 0x2ce   :  { %v254_v55 = vmax.f32 %v251_v53, 0.0 }
 0x2d0   :  { %v255_v56 = vpack.c.bf16 %v254_v55, %v253_v54 }
 0x2d2   :  { %1269 = vmatmul.msk.bf16.vlgmr.msrb.gmra.mxu3 %vm235_vm3, %v255_v56 }
 0x2d3   :  { %776 = vmatpush.bf16.msrb.mxu3 %v1582_v23 }
 0x355   :  { %v301_v61 = vpop.f32.mrf.mxu3 }
 0x356   :  { %v306_v62 = vadd.f32 %v301_v61, %v196_v42  ;;  %v1573_v61 = vld [vmem:[#allocation2 + $0x170] sm:$0xff] }
 0x357   :  { %657 = vmatpush.bf16.msrb.mxu1 %v1573_v61  ;;  %v1594_v61 = vld [vmem:[#allocation2 + $0xd8] sm:$0xff] }
 0x358   :  { %v313_v1 = vadd.f32 %v1615_v63, %v306_v62  ;;  %v1572_v62 = vld [vmem:[#allocation2 + $0x168] sm:$0xff] }
 0x35a   :  { %v315_v4 = vmax.f32 %v313_v1, 0.0  ;;  %v1620_v1 = vld [vmem:[%s1832_s5 + $0x3] ss:$0 sm:$0xff] }
 0x35b   :  { %658 = vmatpush.bf16.msrb.mxu1 %v1572_v62  ;;  %v1593_v62 = vld [vmem:[#allocation2 + $0xd0] sm:$0xff] }
 0x35d   :  { %v303_v0 = vpop.f32.mrf.mxu3 }
 0x35e   :  { %v307_v2 = vadd.f32 %v303_v0, %v197_v43 }
 0x360   :  { %v314_v3 = vadd.f32 %v1615_v63, %v307_v2  ;;  %v1571_v63 = vld [vmem:[#allocation2 + $0x160] sm:$0xff] }
 0x361   :  { %659 = vmatpush.bf16.msrb.mxu1 %v1571_v63  ;;  %v1592_v63 = vld [vmem:[#allocation2 + $0xc8] sm:$0xff] }
 0x362   :  { %v316_v5 = vmax.f32 %v314_v3, 0.0 }
 0x364   :  { %v317_v6 = vpack.c.bf16 %v316_v5, %v315_v4 }
 0x366   :  { %1288 = vmatmul.msk.bf16.vlgmr.msra.gmra.mxu0 %vm235_vm3, %v317_v6 }
 0x367   :  { %843 = vmatpush.bf16.msra.mxu0 %v1586_v35 }
 0x36b   :  { %844 = vmatpush.bf16.msra.mxu0 %v1585_v36 }
 0x36f   :  { %845 = vmatpush.bf16.msra.mxu0 %v1584_v37 }
 0x3e3   :  { %v368_v11 = vpop.f32.mrf.mxu0 }
 0x3e4   :  { %v369_v13 = vadd.f32 %v1616_v12, %v368_v11  ;;  %v1575_v11 = vld [vmem:[#allocation2 + $0x80] sm:$0xff] }
 0x3e5   :  { %726 = vmatpush.bf16.msrb.mxu2 %v1575_v11  ;;  %v1598_v11 = vld [vmem:[#allocation2 + $0x1d8] sm:$0xff] }
 0x3e6   :  { %v373_v17 = vmax.f32 %v369_v13, 0.0 }
 0x3eb   :  { %v370_v15 = vpop.f32.mrf.mxu0 }
 0x3ec   :  { %v371_v16 = vadd.f32 %v1616_v12, %v370_v15  ;;  %v1621_v15 = vld [vmem:[%s1832_s5 + $0xb] ss:$0 sm:$0xff] }
 0x3ee   :  { %v374_v18 = vmax.f32 %v371_v16, 0.0 }
 0x3f0   :  { %v375_v19 = vpack.c.bf16 %v374_v18, %v373_v17 }
 0x3f2   :  { %1305 = vmatmul.msk.bf16.vlgmr.msra.gmra.mxu1 %vm235_vm3, %v375_v19 }
 0x3f3   :  { %896 = vmatpush.bf16.msra.mxu1 %v1590_v49 }
 0x46f   :  { %v421_v24 = vpop.f32.mrf.mxu1 }
 0x470   :  { %v426_v25 = vadd.f32 %v421_v24, %v315_v4  ;;  %v1581_v24 = vld [vmem:[#allocation2 + $0x190] sm:$0xff] }
 0x471   :  { %777 = vmatpush.bf16.msrb.mxu3 %v1581_v24  ;;  %v1602_v24 = vld [vmem:[#allocation2 + $0xf8] sm:$0xff] }
 0x472   :  { %v433_v28 = vadd.f32 %v1617_v26, %v426_v25  ;;  %v1580_v25 = vld [vmem:[#allocation2 + $0x188] sm:$0xff] }
 0x474   :  { %v435_v31 = vmax.f32 %v433_v28, 0.0  ;;  %v1622_v28 = vld [vmem:[%s1832_s5 + $0x4] ss:$0 sm:$0xff] }
 0x475   :  { %778 = vmatpush.bf16.msrb.mxu3 %v1580_v25  ;;  %v1601_v25 = vld [vmem:[#allocation2 + $0xf0] sm:$0xff] }
 0x477   :  { %v423_v27 = vpop.f32.mrf.mxu1 }
 0x478   :  { %v427_v29 = vadd.f32 %v423_v27, %v316_v5 }
 0x47a   :  { %v434_v30 = vadd.f32 %v1617_v26, %v427_v29  ;;  %v1579_v26 = vld [vmem:[#allocation2 + $0x180] sm:$0xff] }
 0x47b   :  { %779 = vmatpush.bf16.msrb.mxu3 %v1579_v26  ;;  %v1600_v26 = vld [vmem:[#allocation2 + $0xe8] sm:$0xff] }
 0x47c   :  { %v436_v32 = vmax.f32 %v434_v30, 0.0 }
 0x47e   :  { %v437_v33 = vpack.c.bf16 %v436_v32, %v435_v31 }
 0x480   :  { %1324 = vmatmul.msk.bf16.vlgmr.msra.gmra.mxu2 %vm235_vm3, %v437_v33 }
 0x481   :  { %963 = vmatpush.bf16.msra.mxu2 %v1594_v61 }
 0x485   :  { %964 = vmatpush.bf16.msra.mxu2 %v1593_v62 }
 0x489   :  { %965 = vmatpush.bf16.msra.mxu2 %v1592_v63 }
 0x503   :  { %v488_v38 = vpop.f32.mrf.mxu2 }
 0x504   :  { %v489_v40 = vadd.f32 %v1618_v39, %v488_v38  ;;  %v1583_v38 = vld [vmem:[#allocation2 + $0xa0] sm:$0xff] }
 0x505   :  { %846 = vmatpush.bf16.msra.mxu0 %v1583_v38  ;;  %v1606_v38 = vld [vmem:[#allocation2 + $0x1f8] sm:$0xff] }
 0x506   :  { %v493_v43 = vmax.f32 %v489_v40, 0.0 }
 0x50b   :  { %v490_v41 = vpop.f32.mrf.mxu2 }
 0x50c   :  { %v491_v42 = vadd.f32 %v1618_v39, %v490_v41  ;;  %v1623_v41 = vld [vmem:[%s1832_s5 + $0xc] ss:$0 sm:$0xff] }
 0x50e   :  { %v494_v44 = vmax.f32 %v491_v42, 0.0 }
 0x510   :  { %v495_v45 = vpack.c.bf16 %v494_v44, %v493_v43 }
 0x512   :  { %1341 = vmatmul.msk.bf16.vlgmr.msra.gmra.mxu3 %vm235_vm3, %v495_v45 }
 0x513   :  { %1016 = vmatpush.bf16.msra.mxu3 %v1598_v11 }
 0x595   :  { %v541_v50 = vpop.f32.mrf.mxu3 }
 0x596   :  { %v546_v51 = vadd.f32 %v541_v50, %v435_v31  ;;  %v1589_v50 = vld [vmem:[#allocation2 + $0x1b0] sm:$0xff] }
 0x597   :  { %897 = vmatpush.bf16.msra.mxu1 %v1589_v50  ;;  %v1610_v50 = vld [vmem:[%s1833_s6 + $0x18] sm:$0xff] }
 0x598   :  { %v553_v54 = vadd.f32 %v1619_v52, %v546_v51  ;;  %v1588_v51 = vld [vmem:[#allocation2 + $0x1a8] sm:$0xff] }
 0x59a   :  { %v555_v57 = vmax.f32 %v553_v54, 0.0  ;;  %v1624_v54 = vld [vmem:[%s1832_s5 + $0x5] ss:$0 sm:$0xff] }
 0x59b   :  { %898 = vmatpush.bf16.msra.mxu1 %v1588_v51  ;;  %v1609_v51 = vld [vmem:[%s1833_s6 + $0x10] sm:$0xff] }
 0x59d   :  { %v543_v53 = vpop.f32.mrf.mxu3 }
 0x59e   :  { %v547_v55 = vadd.f32 %v543_v53, %v436_v32 }
 0x5a0   :  { %v554_v56 = vadd.f32 %v1619_v52, %v547_v55  ;;  %v1587_v52 = vld [vmem:[#allocation2 + $0x1a0] sm:$0xff] }
 0x5a1   :  { %899 = vmatpush.bf16.msra.mxu1 %v1587_v52  ;;  %v1608_v52 = vld [vmem:[%s1833_s6 + $0x8] sm:$0xff] }
 0x5a2   :  { %v556_v58 = vmax.f32 %v554_v56, 0.0 }
 0x5a4   :  { %v557_v59 = vpack.c.bf16 %v556_v58, %v555_v57 }
 0x5a6   :  { %1360 = vmatmul.msk.bf16.vlgmr.msrb.gmra.mxu0 %vm235_vm3, %v557_v59 }
 0x5a7   :  { %1083 = vmatpush.bf16.msrb.mxu0 %v1602_v24 }
 0x5ab   :  { %1084 = vmatpush.bf16.msrb.mxu0 %v1601_v25 }
 0x5af   :  { %1085 = vmatpush.bf16.msrb.mxu0 %v1600_v26 }
 0x623   :  { %v608_v0 = vpop.f32.mrf.mxu0 }
 0x624   :  { %v609_v2 = vadd.f32 %v1620_v1, %v608_v0  ;;  %v1591_v0 = vld [vmem:[#allocation2 + $0xc0] sm:$0xff] }
 0x625   :  { %966 = vmatpush.bf16.msra.mxu2 %v1591_v0  ;;  %v1166_v0 = vperm.slane %v1731_v14, 2 }
 0x626   :  { %v613_v5 = vmax.f32 %v609_v2, 0.0 }
 0x62b   :  { %v610_v3 = vpop.f32.mrf.mxu0 }
 0x62c   :  { %v611_v4 = vadd.f32 %v1620_v1, %v610_v3  ;;  %v1625_v3 = vld [vmem:[%s1832_s5 + $0xd] ss:$0 sm:$0xff] }
 0x62e   :  { %v614_v6 = vmax.f32 %v611_v4, 0.0 }
 0x630   :  { %v615_v7 = vpack.c.bf16 %v614_v6, %v613_v5 }
 0x632   :  { %1377 = vmatmul.msk.bf16.vlgmr.msrb.gmra.mxu1 %vm235_vm3, %v615_v7 }
 0x633   :  { %1136 = vmatpush.bf16.msrb.mxu1 %v1606_v38 }
 0x6af   :  { %v661_v12 = vpop.f32.mrf.mxu1 }
 0x6b0   :  { %v666_v13 = vadd.f32 %v661_v12, %v555_v57  ;;  %v1597_v12 = vld [vmem:[#allocation2 + $0x1d0] sm:$0xff] }
 0x6b1   :  { %1017 = vmatpush.bf16.msra.mxu3 %v1597_v12 }
 0x6b2   :  { %v673_v17 = vadd.f32 %v1621_v15, %v666_v13  ;;  %v1596_v13 = vld [vmem:[#allocation2 + $0x1c8] sm:$0xff] }
 0x6b4   :  { %v675_v20 = vmax.f32 %v673_v17, 0.0  ;;  %v1626_v17 = vld [vmem:[%s1832_s5 + $0x6] ss:$0 sm:$0xff] }
 0x6b5   :  { %1018 = vmatpush.bf16.msra.mxu3 %v1596_v13 }
 0x6b7   :  { %v663_v16 = vpop.f32.mrf.mxu1 }
 0x6b8   :  { %v667_v18 = vadd.f32 %v663_v16, %v556_v58 }
 0x6ba   :  { %v674_v19 = vadd.f32 %v1621_v15, %v667_v18  ;;  %v1595_v15 = vld [vmem:[#allocation2 + $0x1c0] sm:$0xff] }
 0x6bb   :  { %1019 = vmatpush.bf16.msra.mxu3 %v1595_v15 }
 0x6bc   :  { %v676_v21 = vmax.f32 %v674_v19, 0.0 }
 0x6be   :  { %v677_v22 = vpack.c.bf16 %v676_v21, %v675_v20 }
 0x6c0   :  { %1396 = vmatmul.msk.bf16.vlgmr.msrb.gmra.mxu2 %vm235_vm3, %v677_v22 }
 0x6c1   :  { %1198 = vmatpush.bf16.msrb.mxu2 %v1610_v50 }
 0x6c5   :  { %1199 = vmatpush.bf16.msrb.mxu2 %v1609_v51 }
 0x6c9   :  { %1200 = vmatpush.bf16.msrb.mxu2 %v1608_v52 }
 0x743   :  { %v728_v27 = vpop.f32.mrf.mxu2 }
 0x744   :  { %v729_v29 = vadd.f32 %v1622_v28, %v728_v27  ;;  %v1599_v27 = vld [vmem:[#allocation2 + $0xe0] sm:$0xff] }
 0x745   :  { %1086 = vmatpush.bf16.msrb.mxu0 %v1599_v27 }
 0x746   :  { %v733_v32 = vmax.f32 %v729_v29, 0.0 }
 0x74b   :  { %v730_v30 = vpop.f32.mrf.mxu2 }
 0x74c   :  { %v731_v31 = vadd.f32 %v1622_v28, %v730_v30  ;;  %v1627_v30 = vld [vmem:[%s1832_s5 + $0xe] ss:$0 sm:$0xff] }
 0x74e   :  { %v734_v33 = vmax.f32 %v731_v31, 0.0 }
 0x750   :  { %v735_v34 = vpack.c.bf16 %v734_v33, %v733_v32 }
 0x752   :  { %1413 = vmatmul.msk.bf16.vlgmr.msrb.gmra.mxu3 %vm235_vm3, %v735_v34 }
 0x7d5   :  { %v781_v39 = vpop.f32.mrf.mxu3 }
 0x7d6   :  { %v786_v40 = vadd.f32 %v781_v39, %v675_v20  ;;  %v1605_v39 = vld [vmem:[#allocation2 + $0x1f0] sm:$0xff] }
 0x7d7   :  { %1137 = vmatpush.bf16.msrb.mxu1 %v1605_v39 }
 0x7d8   :  { %v793_v43 = vadd.f32 %v1623_v41, %v786_v40  ;;  %v1604_v40 = vld [vmem:[#allocation2 + $0x1e8] sm:$0xff] }
 0x7da   :  { %v795_v46 = vmax.f32 %v793_v43, 0.0  ;;  %v1628_v43 = vld [vmem:[%s1832_s5 + $0x7] ss:$0 sm:$0xff] }
 0x7db   :  { %1138 = vmatpush.bf16.msrb.mxu1 %v1604_v40 }
 0x7dd   :  { %v783_v42 = vpop.f32.mrf.mxu3 }
 0x7de   :  { %v787_v44 = vadd.f32 %v783_v42, %v676_v21 }
 0x7e0   :  { %v794_v45 = vadd.f32 %v1623_v41, %v787_v44  ;;  %v1603_v41 = vld [vmem:[#allocation2 + $0x1e0] sm:$0xff] }
 0x7e1   :  { %1139 = vmatpush.bf16.msrb.mxu1 %v1603_v41 }
 0x7e2   :  { %v796_v47 = vmax.f32 %v794_v45, 0.0 }
 0x7e4   :  { %v797_v48 = vpack.c.bf16 %v796_v47, %v795_v46 }
 0x7e6   :  { %1432 = vmatmul.msk.bf16.vlgmr.msra.gmra.mxu0 %vm235_vm3, %v797_v48 }
 0x863   :  { %v848_v53 = vpop.f32.mrf.mxu0 }
 0x864   :  { %v849_v55 = vadd.f32 %v1624_v54, %v848_v53  ;;  %v1607_v53 = vld [vmem:[%s1833_s6] sm:$0xff] }
 0x865   :  { %1201 = vmatpush.bf16.msrb.mxu2 %v1607_v53 }
 0x866   :  { %v853_v58 = vmax.f32 %v849_v55, 0.0 }
 0x86b   :  { %v850_v56 = vpop.f32.mrf.mxu0 }
 0x86c   :  { %v851_v57 = vadd.f32 %v1624_v54, %v850_v56  ;;  %v1629_v56 = vld [vmem:[%s1832_s5 + $0xf] ss:$0 sm:$0xff] }
 0x86e   :  { %v854_v59 = vmax.f32 %v851_v57, 0.0 }
 0x870   :  { %v855_v60 = vpack.c.bf16 %v854_v59, %v853_v58 }
 0x872   :  { %1449 = vmatmul.msk.bf16.vlgmr.msra.gmra.mxu1 %vm235_vm3, %v855_v60 }
 0x8ef   :  { %v901_v1 = vpop.f32.mrf.mxu1 }
 0x8f0   :  { %v906_v2 = vadd.f32 %v901_v1, %v795_v46 }
 0x8f2   :  { %v913_v5 = vadd.f32 %v1625_v3, %v906_v2 }
 0x8f4   :  { %v915_v8 = vmax.f32 %v913_v5, 0.0 }
 0x8f7   :  { %v903_v4 = vpop.f32.mrf.mxu1 }
 0x8f8   :  { %v907_v6 = vadd.f32 %v903_v4, %v796_v47 }
 0x8fa   :  { %v914_v7 = vadd.f32 %v1625_v3, %v907_v6 }
 0x8fc   :  { %v916_v9 = vmax.f32 %v914_v7, 0.0 }
 0x8fe   :  { %v917_v10 = vpack.c.bf16 %v916_v9, %v915_v8 }
 0x900   :  { %1468 = vmatmul.msk.bf16.vlgmr.msra.gmra.mxu2 %vm235_vm3, %v917_v10 }
 0x983   :  { %v968_v16 = vpop.f32.mrf.mxu2 }
 0x984   :  { %v969_v18 = vadd.f32 %v1626_v17, %v968_v16 }
 0x986   :  { %v973_v21 = vmax.f32 %v969_v18, 0.0 }
 0x98b   :  { %v970_v19 = vpop.f32.mrf.mxu2 }
 0x98c   :  { %v971_v20 = vadd.f32 %v1626_v17, %v970_v19 }
 0x98e   :  { %v974_v22 = vmax.f32 %v971_v20, 0.0 }
 0x990   :  { %v975_v23 = vpack.c.bf16 %v974_v22, %v973_v21 }
 0x992   :  { %1485 = vmatmul.msk.bf16.vlgmr.msra.gmra.mxu3 %vm235_vm3, %v975_v23 }
 0xa15   :  { %v1021_v28 = vpop.f32.mrf.mxu3 }
 0xa16   :  { %v1026_v29 = vadd.f32 %v1021_v28, %v915_v8 }
 0xa18   :  { %v1033_v32 = vadd.f32 %v1627_v30, %v1026_v29 }
 0xa1a   :  { %v1035_v35 = vmax.f32 %v1033_v32, 0.0 }
 0xa1d   :  { %v1023_v31 = vpop.f32.mrf.mxu3 }
 0xa1e   :  { %v1027_v33 = vadd.f32 %v1023_v31, %v916_v9 }
 0xa20   :  { %v1034_v34 = vadd.f32 %v1627_v30, %v1027_v33 }
 0xa22   :  { %v1036_v36 = vmax.f32 %v1034_v34, 0.0 }
 0xa24   :  { %v1037_v37 = vpack.c.bf16 %v1036_v36, %v1035_v35 }
 0xa26   :  { %1504 = vmatmul.msk.bf16.vlgmr.msrb.gmra.mxu0 %vm235_vm3, %v1037_v37 }
 0xaa3   :  { %v1088_v42 = vpop.f32.mrf.mxu0 }
 0xaa4   :  { %v1089_v44 = vadd.f32 %v1628_v43, %v1088_v42 }
 0xaa6   :  { %v1093_v47 = vmax.f32 %v1089_v44, 0.0 }
 0xaab   :  { %v1090_v45 = vpop.f32.mrf.mxu0 }
 0xaac   :  { %v1091_v46 = vadd.f32 %v1628_v43, %v1090_v45 }
 0xaae   :  { %v1094_v48 = vmax.f32 %v1091_v46, 0.0 }
 0xab0   :  { %v1095_v49 = vpack.c.bf16 %v1094_v48, %v1093_v47 }
 0xab2   :  { %1521 = vmatmul.msk.bf16.vlgmr.msrb.gmra.mxu1 %vm235_vm3, %v1095_v49 }
 0xb2f   :  { %v1141_v54 = vpop.f32.mrf.mxu1 }
 0xb30   :  { %v1146_v55 = vadd.f32 %v1141_v54, %v1035_v35 }
 0xb32   :  { %v1153_v58 = vadd.f32 %v1629_v56, %v1146_v55 }
 0xb34   :  { %v1155_v61 = vmax.f32 %v1153_v58, 0.0 }
 0xb37   :  { %v1143_v57 = vpop.f32.mrf.mxu1 }
 0xb38   :  { %v1147_v59 = vadd.f32 %v1143_v57, %v1036_v36 }
 0xb3a   :  { %v1154_v60 = vadd.f32 %v1629_v56, %v1147_v59 }
 0xb3c   :  { %v1156_v62 = vmax.f32 %v1154_v60, 0.0 }
 0xb3e   :  { %v1157_v63 = vpack.c.bf16 %v1156_v62, %v1155_v61 }
 0xb40   :  { %1539 = vmatmul.msk.bf16.vlgmr.msrb.gmra.mxu2 %vm235_vm3, %v1157_v63 }
 0xbc3   :  { %v1203_v1 = vpop.f32.mrf.mxu2 }
 0xbc4   :  { %v1204_v2 = vadd.f32 %v1203_v1, %v1166_v0 }
 0xbc6   :  { %1208 = vst.msk [vmem:[%s1835_s8] sm:$0xff] %vm54_vm2, %v1204_v2 }
 0xbcb   :  { %v1205_v3 = vpop.f32.mrf.mxu2 }
 0xbcc   :  { %v1206_v4 = vadd.f32 %v1205_v3, %v1166_v0 }
 0xbce   :  { %1209 = vst.msk [vmem:[%s1835_s8 + $0x8] sm:$0xff] %vm54_vm2, %v1206_v4 }
 0xbcf   :  { %1214 = vsyncpa [#allocation3], 1 }

</bundles_post_ra>
